<compile_context>
chip_gen: v5e
topology: v5e:2x2
jax: 0.10.0
libtpu: 0.0.40
codegen_flags: <defaults>
</compile_context>

<pallas_src>
import jax
import jax.numpy as jnp
from jax.experimental import pallas as pl
from jax.experimental.pallas import tpu as pltpu


def rgcn_kernel(a_ref, y_ref, dn_ref, o_ref, agg_ref):
    # grid = (dst_tile i, relation r, src_tile j)
    r = pl.program_id(1)
    j = pl.program_id(2)
    n_src_tiles = pl.num_programs(2)

    @pl.when((r == 0) & (j == 0))
    def _():
        o_ref[...] = jnp.zeros_like(o_ref)          # f32 output doubles as cross-relation acc

    @pl.when(j == 0)
    def _():
        agg_ref[...] = jnp.zeros_like(agg_ref)      # per-relation src-reduction accumulator

    # bf16 x bf16 MXU matmul, f32 accumulation: agg += A_r^T[dst_tile, src_tile] @ Y_r[src_tile]
    agg_ref[...] += jnp.dot(a_ref[...], y_ref[...], preferred_element_type=jnp.float32)

    @pl.when(j == n_src_tiles - 1)
    def _():
        # D_dst^-1/2 scaling + sum over relations (bias added in the wrapper).
        o_ref[...] += agg_ref[...] * dn_ref[...]


def _vmem_capacity_bytes():
    try:
        return int(pltpu.get_tpu_info().vmem_capacity_bytes)
    except Exception:
        return 128 * 1024 * 1024  # v5e/v6e default


def _choose_tile(n, max_tile, *, align=128, min_tiles=1):
    """Largest multiple of `align` dividing n, <= max_tile, giving >= min_tiles tiles.

    `n` is assumed to be either <= align (full-extent single tile) or a multiple of
    `align` (the wrapper pads N to a multiple of 128), so `align` is always a valid
    fallback and no degenerate oversized block can be produced.
    """
    if n <= align:
        return n
    best = align
    t = align
    cap = min(max_tile, n)
    while t <= cap:
        if n % t == 0 and (n // t) >= min_tiles:
            best = t
        t += align
    return best


def rgcn_forward(adj, feats, weights, biases, *, max_dst_tile=512, max_src_tile=512):
    """adj: (R, N_src, N_dst) 0/1, feats: (N, E) f32, weights: (R, E, E), biases: (R, 1, E)."""
    R, Ns, Nd = adj.shape
    N, E = feats.shape
    assert Ns == N and Nd == N, "square single-node-type graph expected"
    assert feats.dtype == jnp.float32, "f32 features expected (output accumulates in f32)"

    # ---- lane/sublane-dense zero padding (multiples of 128) ----
    Np = ((N + 127) // 128) * 128
    E_pad = ((E + 127) // 128) * 128
    adj_p = jnp.pad(adj, ((0, 0), (0, Np - N), (0, Np - N))) if Np != N else adj
    feats_p = (jnp.pad(feats, ((0, Np - N), (0, E_pad - E)))
               if (Np != N or E_pad != E) else feats)
    weights_p = (jnp.pad(weights, ((0, 0), (0, E_pad - E), (0, E_pad - E)))
                 if E_pad != E else weights).astype(jnp.float32)

    # ---- precompute degree norms + per-relation projection in XLA (f32), cast to bf16 ----
    # Padded rows/cols of A are zero so real-node degrees are unchanged; clamps handle pads.
    out_deg = jnp.maximum(jnp.sum(adj_p, axis=2), 1.0)                   # (R, Np) src degree
    in_deg = jnp.maximum(jnp.sum(adj_p, axis=1), 1.0)                    # (R, Np) dst degree
    src_norm = (1.0 / jnp.sqrt(out_deg))[..., None]                      # (R, Np, 1) f32
    dst_norm = (1.0 / jnp.sqrt(in_deg))[..., None].astype(jnp.float32)   # (R, Np, 1) f32

    # Y_r = (D_src^-1/2 * X) @ W_r  — projection FLOPs (2RNE^2) are negligible vs the
    # aggregation (2RN^2E); bf16 cast is the only approximation fed to the kernel.
    y = jnp.matmul(src_norm * feats_p[None], weights_p)                  # (R, Np, E_pad) f32
    y = y.astype(jnp.bfloat16)

    # Pre-transposed bf16 adjacency: A_t[r, dst, src]; 0/1 is exact in bf16.
    adj_t = jnp.swapaxes(adj_p, 1, 2).astype(jnp.bfloat16)               # (R, Np, Np)

    # Bias is dst-independent per relation -> sum over relations once, add after kernel.
    bias_sum = jnp.sum(biases, axis=0).astype(jnp.float32)               # (1, E)

    # ---- tiling: >= 2 dst tiles when possible so the parallel axis feeds both v7x cores ----
    min_dst_tiles = 2 if Np >= 256 else 1
    Td = _choose_tile(Np, max_dst_tile, min_tiles=min_dst_tiles)
    Ts = _choose_tile(Np, max_src_tile)
    dst_tiles = Np // Td
    src_tiles = Np // Ts
    grid = (dst_tiles, R, src_tiles)

    # ---- generation-aware VMEM budget (estimate already includes double-buffering) ----
    blk_bytes = (2 * Td * Ts * 2           # A_t tiles (bf16, 2 buffers)
                 + 2 * Ts * E_pad * 2      # Y tiles (bf16, 2 buffers)
                 + 2 * Td * 4              # dst_norm tiles
                 + 2 * Td * E_pad * 4      # output block (conservative 2x)
                 + Td * E_pad * 4)         # per-relation agg scratch
    vmem_cap = _vmem_capacity_bytes()
    vmem_limit = int(min(max(blk_bytes + (4 << 20), 16 << 20),
                         min(48 << 20, vmem_cap // 2)))

    cost = pl.CostEstimate(
        flops=int(2 * R * Np * Np * E_pad),
        transcendentals=0,
        bytes_accessed=int(R * Np * Np * 2                      # A read once
                           + dst_tiles * R * Np * E_pad * 2     # Y re-streamed per dst tile
                           + dst_tiles * R * Np * 4             # dst_norm
                           + Np * E_pad * 4),                   # output written
    )

    out_padded = pl.pallas_call(
        rgcn_kernel,
        out_shape=jax.ShapeDtypeStruct((Np, E_pad), jnp.float32),
        grid_spec=pltpu.PrefetchScalarGridSpec(
            num_scalar_prefetch=0,
            grid=grid,
            in_specs=[
                pl.BlockSpec((None, Td, Ts), lambda i, r, j: (r, i, j)),      # A_t tile (bf16)
                pl.BlockSpec((None, Ts, E_pad), lambda i, r, j: (r, j, 0)),   # Y_r tile (bf16)
                pl.BlockSpec((None, Td, 1), lambda i, r, j: (r, i, 0)),       # dst norm (f32)
            ],
            out_specs=pl.BlockSpec((Td, E_pad), lambda i, r, j: (i, 0)),      # resident acc
            scratch_shapes=[pltpu.VMEM((Td, E_pad), jnp.float32)],            # per-rel agg
        ),
        compiler_params=pltpu.CompilerParams(
            dimension_semantics=("parallel", "arbitrary", "arbitrary"),
            vmem_limit_bytes=vmem_limit,
        ),
        cost_estimate=cost,
    )(adj_t, y, dst_norm)

    return out_padded[:N, :E] + bias_sum


def rgcn_ref(adj, feats, weights, biases):
    """Pure-JAX reference matching DGL GraphConv(norm='both') + HeteroGraphConv(sum)."""
    out = jnp.zeros((feats.shape[0], weights.shape[2]), jnp.float32)
    for r in range(adj.shape[0]):
        A = adj[r]
        out_deg = jnp.maximum(A.sum(axis=1, keepdims=True), 1.0)        # (N, 1)
        in_deg = jnp.maximum(A.sum(axis=0, keepdims=True).T, 1.0)       # (N, 1)
        Xn = feats / jnp.sqrt(out_deg)
        agg = A.T @ Xn
        agg = agg / jnp.sqrt(in_deg)
        out = out + agg @ weights[r] + biases[r]
    return out


if __name__ == "__main__":
    num_nodes, embed_size, num_rels = 64, 32, 3

    key = jax.random.PRNGKey(0)
    k_adj, k_feat, k_w, k_b = jax.random.split(key, 4)

    # Deterministic synthetic graph: per-relation dense adjacency (Bernoulli edges).
    adj = jax.random.bernoulli(
        k_adj, p=0.2, shape=(num_rels, num_nodes, num_nodes)).astype(jnp.float32)
    # Node features (module's forward takes features directly; self.embed is unused).
    features = jax.random.normal(k_feat, (num_nodes, embed_size), jnp.float32)
    # Per-relation GraphConv parameters: weight [E, E] and bias [1, E].
    weights = 0.1 * jax.random.normal(k_w, (num_rels, embed_size, embed_size), jnp.float32)
    biases = 0.01 * jax.random.normal(k_b, (num_rels, 1, embed_size), jnp.float32)

    out = rgcn_forward(adj, features, weights, biases)
    out = jax.block_until_ready(out)

    ref = rgcn_ref(adj, features, weights, biases)
    assert out.shape == (num_nodes, embed_size)
    # bf16 cast of the projected/normalized features is a deliberate precision trade
    # (f32 accumulation keeps the error bounded) -> relaxed tolerance.
    max_err = float(jnp.max(jnp.abs(out - ref)))
    assert jnp.allclose(out, ref, rtol=1e-2, atol=1e-2), \
        f"Pallas RGCN mismatch vs reference (max abs err {max_err})"

    print("KERNEL_OK")
</pallas_src>

<mosaic_0001>
module attributes {stable_mosaic.version = 11 : i64} {
  func.func @rgcn_kernel(%arg0: i32, %arg1: i32, %arg2: i32, %arg3: memref<1x128x128xbf16, #tpu.memory_space<vmem>>, %arg4: memref<1x128x128xbf16, #tpu.memory_space<vmem>>, %arg5: memref<1x128x1xf32, #tpu.memory_space<vmem>>, %arg6: memref<128x128xf32, #tpu.memory_space<vmem>>, %arg7: memref<128x128xf32, #tpu.memory_space<vmem>>) attributes {dimension_semantics = [#tpu.dimension_semantics<parallel>, #tpu.dimension_semantics<arbitrary>, #tpu.dimension_semantics<arbitrary>], iteration_bounds = array<i64: 1, 3, 1>, scalar_prefetch = 0 : i64, scratch_operands = 1 : i64, tpu.core_type = #tpu.core_type<tc>, window_params = [{transform_indices = @transform_0, window_bounds = array<i64: 1, 128, 128>}, {transform_indices = @transform_1, window_bounds = array<i64: 1, 128, 128>}, {transform_indices = @transform_2, window_bounds = array<i64: 1, 128, 1>}, {transform_indices = @transform_3, window_bounds = array<i64: 128, 128>}]} {
    %c0_i32 = arith.constant 0 : i32
    %0 = arith.cmpi eq, %arg1, %c0_i32 : i32
    %c0_i32_0 = arith.constant 0 : i32
    %1 = arith.cmpi eq, %arg2, %c0_i32_0 : i32
    %2 = arith.andi %0, %1 : i1
    %3 = arith.extui %2 : i1 to i32
    %c0_i32_1 = arith.constant 0 : i32
    %4 = arith.cmpi ne, %3, %c0_i32_1 : i32
    scf.if %4 {
      %cst_15 = arith.constant 0.000000e+00 : f32
      %19 = vector.broadcast %cst_15 : f32 to vector<128x128xf32>
      %c0_16 = arith.constant 0 : index
      %c0_17 = arith.constant 0 : index
      %20 = vector.load %arg6[%c0_16, %c0_17] : memref<128x128xf32, #tpu.memory_space<vmem>>, vector<128x128xf32>
      tpu.vector_store %arg6[%c0_16, %c0_17], %19 {strides = array<i32>} : memref<128x128xf32, #tpu.memory_space<vmem>>, vector<128x128xf32>,
    } else {
    }
    %c0_i32_2 = arith.constant 0 : i32
    %5 = arith.cmpi eq, %arg2, %c0_i32_2 : i32
    %6 = arith.extui %5 : i1 to i32
    %c0_i32_3 = arith.constant 0 : i32
    %7 = arith.cmpi ne, %6, %c0_i32_3 : i32
    scf.if %7 {
      %cst_15 = arith.constant 0.000000e+00 : f32
      %19 = vector.broadcast %cst_15 : f32 to vector<128x128xf32>
      %c0_16 = arith.constant 0 : index
      %c0_17 = arith.constant 0 : index
      %20 = vector.load %arg7[%c0_16, %c0_17] : memref<128x128xf32, #tpu.memory_space<vmem>>, vector<128x128xf32>
      tpu.vector_store %arg7[%c0_16, %c0_17], %19 {strides = array<i32>} : memref<128x128xf32, #tpu.memory_space<vmem>>, vector<128x128xf32>,
    } else {
    }
    %c0 = arith.constant 0 : index
    %c0_4 = arith.constant 0 : index
    %8 = vector.load %arg7[%c0, %c0_4] : memref<128x128xf32, #tpu.memory_space<vmem>>, vector<128x128xf32>
    %c0_5 = arith.constant 0 : index
    %c0_6 = arith.constant 0 : index
    %c0_7 = arith.constant 0 : index
    %9 = vector.load %arg3[%c0_5, %c0_6, %c0_7] : memref<1x128x128xbf16, #tpu.memory_space<vmem>>, vector<1x128x128xbf16>
    %10 = vector.shape_cast %9 : vector<1x128x128xbf16> to vector<128x128xbf16>
    %c0_8 = arith.constant 0 : index
    %c0_9 = arith.constant 0 : index
    %c0_10 = arith.constant 0 : index
    %11 = vector.load %arg4[%c0_8, %c0_9, %c0_10] : memref<1x128x128xbf16, #tpu.memory_space<vmem>>, vector<1x128x128xbf16>
    %12 = vector.shape_cast %11 : vector<1x128x128xbf16> to vector<128x128xbf16>
    %cst = arith.constant dense<0.000000e+00> : vector<128x128xf32>
    %13 = tpu.matmul %10, %12, %cst {dimension_numbers = #tpu.dot_dimension_numbers<[1], [0], [0], [1], [0, 0, 1, 1], [], []>} : vector<128x128xbf16>, vector<128x128xbf16>, vector<128x128xf32> -> vector<128x128xf32>
    %14 = arith.addf %8, %13 : vector<128x128xf32>
    %c0_11 = arith.constant 0 : index
    %c0_12 = arith.constant 0 : index
    %15 = vector.load %arg7[%c0_11, %c0_12] : memref<128x128xf32, #tpu.memory_space<vmem>>, vector<128x128xf32>
    tpu.vector_store %arg7[%c0_11, %c0_12], %14 {strides = array<i32>} : memref<128x128xf32, #tpu.memory_space<vmem>>, vector<128x128xf32>,
    %c0_i32_13 = arith.constant 0 : i32
    %16 = arith.cmpi eq, %arg2, %c0_i32_13 : i32
    %17 = arith.extui %16 : i1 to i32
    %c0_i32_14 = arith.constant 0 : i32
    %18 = arith.cmpi ne, %17, %c0_i32_14 : i32
    scf.if %18 {
      %c0_15 = arith.constant 0 : index
      %c0_16 = arith.constant 0 : index
      %19 = vector.load %arg6[%c0_15, %c0_16] : memref<128x128xf32, #tpu.memory_space<vmem>>, vector<128x128xf32>
      %c0_17 = arith.constant 0 : index
      %c0_18 = arith.constant 0 : index
      %20 = vector.load %arg7[%c0_17, %c0_18] : memref<128x128xf32, #tpu.memory_space<vmem>>, vector<128x128xf32>
      %c0_19 = arith.constant 0 : index
      %c0_20 = arith.constant 0 : index
      %c0_21 = arith.constant 0 : index
      %21 = vector.load %arg5[%c0_19, %c0_20, %c0_21] : memref<1x128x1xf32, #tpu.memory_space<vmem>>, vector<1x128x1xf32>
      %22 = vector.shape_cast %21 : vector<1x128x1xf32> to vector<128x1xf32>
      %23 = vector.broadcast %22 : vector<128x1xf32> to vector<128x128xf32>
      %24 = arith.mulf %20, %23 : vector<128x128xf32>
      %25 = arith.addf %19, %24 : vector<128x128xf32>
      %c0_22 = arith.constant 0 : index
      %c0_23 = arith.constant 0 : index
      %26 = vector.load %arg6[%c0_22, %c0_23] : memref<128x128xf32, #tpu.memory_space<vmem>>, vector<128x128xf32>
      tpu.vector_store %arg6[%c0_22, %c0_23], %25 {strides = array<i32>} : memref<128x128xf32, #tpu.memory_space<vmem>>, vector<128x128xf32>,
    } else {
    }
    return
  }
  func.func @transform_0(%arg0: i32, %arg1: i32, %arg2: i32) -> (i32, i32, i32) {
    %c0_i32 = arith.constant 0 : i32
    return %arg1, %arg0, %arg2 : i32, i32, i32
  }
  func.func @transform_1(%arg0: i32, %arg1: i32, %arg2: i32) -> (i32, i32, i32) {
    %c0_i32 = arith.constant 0 : i32
    %c0_i32_0 = arith.constant 0 : i32
    return %arg1, %arg2, %c0_i32 : i32, i32, i32
  }
  func.func @transform_2(%arg0: i32, %arg1: i32, %arg2: i32) -> (i32, i32, i32) {
    %c0_i32 = arith.constant 0 : i32
    %c0_i32_0 = arith.constant 0 : i32
    return %arg1, %arg0, %c0_i32 : i32, i32, i32
  }
  func.func @transform_3(%arg0: i32, %arg1: i32, %arg2: i32) -> (i32, i32) {
    %c0_i32 = arith.constant 0 : i32
    %c0_i32_0 = arith.constant 0 : i32
    return %arg0, %c0_i32 : i32, i32
  }
}

</mosaic_0001>

<bundles_post_ra>
// kernel: tpu_custom_call.1
= control target key start
LH: loop header
LB: loop body
LE: loop exit
PB: predicated region body
PF: predicated region fallthrough
CT: control target
= control target key end

     0   :  { %8 = vsyncpa [#allocation4], 0  ;;  %s1080_s12 = smov 0   ;;  %s1082_s13 = smov 0   ;;  %s1166_s0 = inlined_call_operand.vmem [shape: bf16[3,128,128], index: 0, kind: input, shape index: {}]   ;;  %s1167_s1 = inlined_call_operand.vmem [shape: bf16[3,128,128], index: 1, kind: input, shape index: {}]   ;;  %s1168_s2 = inlined_call_operand.vmem [shape: f32[3,128,1], index: 2, kind: input, shape index: {}]   ;;  %s1169_s3 = inlined_call_operand.hbm [shape: f32[128,128], index: 3, kind: output, shape index: {}]  }
   0x1   :  { %s1084_s14 = smov 0  }
   0x2 LB: > { %s838_s15 = sadd.s32 4294967295, %s1053_s14   ;;  %s29_s16 = sadd.s32 1, %s1049_s13  ;;  %s1053_s14 = sphi %s1084_s14, %s14_s14   ;;  %s1049_s13 = sphi %s1082_s13, %s1171_s13   ;;  %s1045_s12 = sphi %s1080_s12, %s1170_s12  }
   0x3   : > { %p31_p0 = scmp.ge.s32.totalorder %s29_s16, 3  ;;  %p841_p1 = scmp.ge.s32.totalorder %s1053_s14, 1 }
   0x4   : > { %p203_p2 = scmp.lt.s32.totalorder %s1053_s14, 4 }
   0x5   : > { %s1173_s16 = smov (%p31_p0, %s29_s16), 0 }
   0x6   : > { %p204_p3 = pnand %p841_p1, %p203_p2 }
   0x7   : > { %p248_p4 = scmp.lt.s32.totalorder (!%p204_p3), %s1045_s12, 2  ;;  %p281_p5 = scmp.eq.s32.totalorder (!%p204_p3), %s1045_s12, 0 }
   0x8   : > { %207 = sbr.rel (%p204_p3) target bundleno = 230 (0xe6), region = 32 }
   0xd   : > { %s1175_s12 = smov (!%p248_p4, %s1045_s12), 2  ;;  %286 = sbr.rel (!%p281_p5) target bundleno = 30 (0x1e), region = 36  ;;  %v1055_v0 = vmov (%p281_p5), 0.0  }
   0xe   : > { %s917_s17 = sshll.u32 %s1175_s12, 6  ;;  %s919_s18 = sshll.u32 %s1175_s12, 7  ;;  %287 = vst [vmem:[#allocation3] sm:$0xff] (%p281_p5), %v1055_v0 }
   0xf   : > { %s1102_s21 = scalar_lea.vmem %s1166_s0, %s917_s17  ;;  %s1107_s24 = scalar_lea.vmem %s1167_s1, %s917_s17  ;;  %288 = vst [vmem:[#allocation3 + $0x8] sm:$0xff] (%p281_p5), %v1055_v0 }
  0x10   : > { %s1112_s27 = scalar_lea.vmem %s1168_s2, %s919_s18  ;;  %289 = vst [vmem:[#allocation3 + $0x10] sm:$0xff] (%p281_p5), %v1055_v0 }
  0x11   : > { %290 = vst [vmem:[#allocation3 + $0x18] sm:$0xff] (%p281_p5), %v1055_v0 }
  0x12   : > { %291 = vst [vmem:[#allocation3 + $0x20] sm:$0xff] %v1055_v0 }
  0x13   : > { %292 = vst [vmem:[#allocation3 + $0x28] sm:$0xff] %v1055_v0 }
  0x14   : > { %293 = vst [vmem:[#allocation3 + $0x30] sm:$0xff] %v1055_v0 }
  0x15   : > { %294 = vst [vmem:[#allocation3 + $0x38] sm:$0xff] %v1055_v0 }
  0x16   : > { %295 = vst [vmem:[#allocation3 + $0x40] sm:$0xff] %v1055_v0 }
  0x17   : > { %296 = vst [vmem:[#allocation3 + $0x48] sm:$0xff] %v1055_v0 }
  0x18   : > { %297 = vst [vmem:[#allocation3 + $0x50] sm:$0xff] %v1055_v0 }
  0x19   : > { %298 = vst [vmem:[#allocation3 + $0x58] sm:$0xff] %v1055_v0 }
  0x1a   : > { %299 = vst [vmem:[#allocation3 + $0x60] sm:$0xff] %v1055_v0 }
  0x1b   : > { %300 = vst [vmem:[#allocation3 + $0x68] sm:$0xff] %v1055_v0 }
  0x1c   : > { %301 = vst [vmem:[#allocation3 + $0x70] sm:$0xff] %v1055_v0 }
  0x1d   : > { %302 = vst [vmem:[#allocation3 + $0x78] sm:$0xff] %v1055_v0 }
  0x1e PF: > { %v582_v1 = vld [vmem:[%s1112_s27] sm:$0xff]  ;;  %v936_v2 = vld [vmem:[%s1107_s24 + $0x38] sm:$0xff]  ;;  %v1056_v3 = vmov 0   ;;  %v584_v4 = vld [vmem:[%s1112_s27 + $0x10] sm:$0xff]  ;;  %s1057_s28 = smov [#allocation3]   ;;  %s736_s5 = sshll.u32 %s1169_s3, 4  ;;  %s737_s5 = int_to_ptr.hbm [resolvable:$true] %s736_s5 }
  0x1f   : > { %996 = vset.pattern.permute.xlu0 %v1056_v3  ;;  %997 = vset.pattern.permute.xlu1 %v1056_v3  ;;  %v935_v5 = vld [vmem:[%s1107_s24 + $0x30] sm:$0xff]  ;;  %v934_v6 = vld [vmem:[%s1107_s24 + $0x28] sm:$0xff]  ;;  %v586_v7 = vld [vmem:[%s1112_s27 + $0x20] sm:$0xff]  ;;  %s734_s29 = sshll.u32 %s1057_s28, 4  ;;  %p965_p6 = scmp.eq.s32.totalorder %s838_s15, 2  ;;  %s735_s29 = int_to_ptr.vmem [resolvable:$true] %s734_s29 }
  0x20   : > { %600 = vperm.xlu0 %996, %v582_v1   ;;  %466 = vmatpush.bf16.msra.mxu0 %v936_v2  ;;  %v583_v8 = vld [vmem:[%s1112_s27 + $0x8] sm:$0xff]  ;;  %v585_v9 = vld [vmem:[%s1112_s27 + $0x18] sm:$0xff]  ;;  %v933_v10 = vld [vmem:[%s1107_s24 + $0x20] sm:$0xff]  ;;  %s1058_s6 = smov 128   ;;  %s1059_s7 = smov 8  }
  0x21   : > { %937 = vmatpush.bf16.msra.mxu1 %v936_v2  ;;  %938 = vmatpush.bf16.msra.mxu2 %v936_v2  ;;  %v587_v11 = vld [vmem:[%s1112_s27 + $0x28] sm:$0xff]  ;;  %v932_v12 = vld [vmem:[%s1107_s24 + $0x18] sm:$0xff]  ;;  %v588_v13 = vld [vmem:[%s1112_s27 + $0x30] sm:$0xff] }
  0x22   : > { %939 = vmatpush.bf16.msra.mxu3 %v936_v2  ;;  %610 = vperm.xlu1 %997, %v584_v4   ;;  %v589_v14 = vld [vmem:[%s1112_s27 + $0x38] sm:$0xff]  ;;  %v931_v15 = vld [vmem:[%s1107_s24 + $0x10] sm:$0xff]  ;;  %v590_v16 = vld [vmem:[%s1112_s27 + $0x40] sm:$0xff] }
  0x23   : > { %998 = vset.pattern.permute.xlu2 %v1056_v3  ;;  %v930_v17 = vld [vmem:[%s1107_s24 + $0x8] sm:$0xff]  ;;  %v592_v19 = vld [vmem:[%s1112_s27 + $0x50] sm:$0xff]  ;;  %v929_v20 = vld [vmem:[%s1107_s24] sm:$0xff] }
  0x24   : > { %467 = vmatpush.bf16.msra.mxu0 %v935_v5  ;;  %620 = vperm.xlu2 %998, %v586_v7   ;;  %v591_v18 = vld [vmem:[%s1112_s27 + $0x48] sm:$0xff]  ;;  %v921_v21 = vld [vmem:[%s1102_s21] sm:$0xff]  ;;  %v593_v22 = vld [vmem:[%s1112_s27 + $0x58] sm:$0xff] }
  0x25   : > { %940 = vmatpush.bf16.msra.mxu1 %v935_v5  ;;  %941 = vmatpush.bf16.msra.mxu2 %v935_v5  ;;  %v923_v23 = vld [vmem:[%s1102_s21 + $0x10] sm:$0xff]  ;;  %v594_v24 = vld [vmem:[%s1112_s27 + $0x60] sm:$0xff]  ;;  %v595_v27 = vld [vmem:[%s1112_s27 + $0x68] sm:$0xff] }
  0x26   : > { %942 = vmatpush.bf16.msra.mxu3 %v935_v5  ;;  %v925_v25 = vld [vmem:[%s1102_s21 + $0x20] sm:$0xff]  ;;  %v927_v26 = vld [vmem:[%s1102_s21 + $0x30] sm:$0xff]  ;;  %v597_v29 = vld [vmem:[%s1112_s27 + $0x78] sm:$0xff] }
  0x27   : > { %v596_v28 = vld [vmem:[%s1112_s27 + $0x70] sm:$0xff]  ;;  %v922_v30 = vld [vmem:[%s1102_s21 + $0x8] sm:$0xff]  ;;  %v924_v31 = vld [vmem:[%s1102_s21 + $0x18] sm:$0xff] }
  0x28   : > { %605 = vperm.xlu0 %996, %v583_v8   ;;  %468 = vmatpush.bf16.msra.mxu0 %v934_v6  ;;  %v926_v32 = vld [vmem:[%s1102_s21 + $0x28] sm:$0xff]  ;;  %v928_v33 = vld [vmem:[%s1102_s21 + $0x38] sm:$0xff]  ;;  %v550_v44 = vld [vmem:[#allocation3] sm:$0xff] }
  0x29   : > { %943 = vmatpush.bf16.msra.mxu1 %v934_v6  ;;  %944 = vmatpush.bf16.msra.mxu2 %v934_v6  ;;  %v554_v47 = vld [vmem:[#allocation3 + $0x20] sm:$0xff]  ;;  %v551_v61 = vld [vmem:[#allocation3 + $0x8] sm:$0xff] }
  0x2a   : > { %945 = vmatpush.bf16.msra.mxu3 %v934_v6  ;;  %615 = vperm.xlu1 %997, %v585_v9   ;;  %v558_v55 = vld [vmem:[#allocation3 + $0x40] sm:$0xff]  ;;  %v555_v63 = vld [vmem:[#allocation3 + $0x28] sm:$0xff] }
  0x2b   : > { %v562_v57 = vld [vmem:[#allocation3 + $0x60] sm:$0xff]  ;;  %v559_v9 = vld [vmem:[#allocation3 + $0x48] sm:$0xff] }
  0x2c   : > { %469 = vmatpush.bf16.msra.mxu0 %v933_v10  ;;  %625 = vperm.xlu2 %998, %v587_v11   ;;  %v563_v11 = vld [vmem:[#allocation3 + $0x68] sm:$0xff] }
  0x2d   : > { %946 = vmatpush.bf16.msra.mxu1 %v933_v10  ;;  %947 = vmatpush.bf16.msra.mxu2 %v933_v10 }
  0x2e   : > { %948 = vmatpush.bf16.msra.mxu3 %v933_v10 }
  0x30   : > { %630 = vperm.xlu0 %996, %v588_v13   ;;  %470 = vmatpush.bf16.msra.mxu0 %v932_v12 }
  0x31   : > { %949 = vmatpush.bf16.msra.mxu1 %v932_v12  ;;  %950 = vmatpush.bf16.msra.mxu2 %v932_v12 }
  0x32   : > { %951 = vmatpush.bf16.msra.mxu3 %v932_v12  ;;  %635 = vperm.xlu1 %997, %v589_v14  }
  0x34   : > { %471 = vmatpush.bf16.msra.mxu0 %v931_v15  ;;  %640 = vperm.xlu2 %998, %v590_v16  }
  0x35   : > { %952 = vmatpush.bf16.msra.mxu1 %v931_v15  ;;  %953 = vmatpush.bf16.msra.mxu2 %v931_v15 }
  0x36   : > { %954 = vmatpush.bf16.msra.mxu3 %v931_v15  ;;  %v552_v15 = vld [vmem:[#allocation3 + $0x10] sm:$0xff] }
  0x38   : > { %645 = vperm.xlu0 %996, %v591_v18   ;;  %472 = vmatpush.bf16.msra.mxu0 %v930_v17 }
  0x39   : > { %955 = vmatpush.bf16.msra.mxu1 %v930_v17  ;;  %956 = vmatpush.bf16.msra.mxu2 %v930_v17 }
  0x3a   : > { %957 = vmatpush.bf16.msra.mxu3 %v930_v17  ;;  %650 = vperm.xlu1 %997, %v592_v19   ;;  %v556_v17 = vld [vmem:[#allocation3 + $0x30] sm:$0xff] }
  0x3c   : > { %473 = vmatpush.bf16.msra.mxu0 %v929_v20  ;;  %655 = vperm.xlu2 %998, %v593_v22  }
  0x3d   : > { %958 = vmatpush.bf16.msra.mxu1 %v929_v20  ;;  %959 = vmatpush.bf16.msra.mxu2 %v929_v20 }
  0x3e   : > { %960 = vmatpush.bf16.msra.mxu3 %v929_v20 }
  0x3f   : > { %474 = vmatmul.bf16.vlgmr.msra.gmra.mxu0 %v921_v21 }
  0x40   : > { %660 = vperm.xlu0 %996, %v594_v24   ;;  %484 = vmatmul.bf16.vlgmr.msra.gmra.mxu1 %v923_v23 }
  0x41   : > { %494 = vmatmul.bf16.vlgmr.msra.gmra.mxu2 %v925_v25  ;;  %504 = vmatmul.bf16.vlgmr.msra.gmra.mxu3 %v927_v26  ;;  %v560_v26 = vld [vmem:[#allocation3 + $0x50] sm:$0xff] }
  0x42   : > { %665 = vperm.xlu1 %997, %v595_v27  }
  0x44   : > { %670 = vperm.xlu2 %998, %v596_v28   ;;  %v564_v28 = vld [vmem:[#allocation3 + $0x70] sm:$0xff] }
  0x48   : > { %675 = vperm.xlu0 %996, %v597_v29  }
  0x4f   : > { %479 = vmatmul.bf16.gmra.mxu0 %v922_v30 }
  0x50   : > { %489 = vmatmul.bf16.gmra.mxu1 %v924_v31 }
  0x51   : > { %499 = vmatmul.bf16.gmra.mxu2 %v926_v32  ;;  %509 = vmatmul.bf16.gmra.mxu3 %v928_v33  ;;  %v553_v32 = vld [vmem:[#allocation3 + $0x18] sm:$0xff] }
  0x7e   : > { %v621_v37 = vpop.permute.xlu2 %620 }
  0x86   : > { %v626_v40 = vpop.permute.xlu2 %625 }
  0x8e   : > { %v641_v49 = vpop.permute.xlu2 %640 }
  0x92   : > { %v601_v34 = vpop.permute.xlu0 %600 }
  0x94   : > { %v611_v35 = vpop.permute.xlu1 %610 }
  0x96   : > { %v656_v6 = vpop.permute.xlu2 %655 }
  0x9a   : > { %v606_v36 = vpop.permute.xlu0 %605 }
  0x9c   : > { %v1146_v38 = vpop.permute.xlu1 %615 }
  0x9e   : > { %v671_v24 = vpop.permute.xlu2 %670 }
  0xa2   : > { %v631_v39 = vpop.permute.xlu0 %630 }
  0xa4   : > { %v1148_v41 = vpop.permute.xlu1 %635 }
  0xaa   : > { %v646_v42 = vpop.permute.xlu0 %645 }
  0xac   : > { %v651_v52 = vpop.permute.xlu1 %650 }
  0xb2   : > { %v661_v53 = vpop.permute.xlu0 %660 }
  0xb4   : > { %v666_v7 = vpop.permute.xlu1 %665 }
  0xbc   : > { %v475_v43 = vpop.f32.mrf.mxu0 }
  0xbd   : > { %v678_v45 = vmul.f32 %v601_v34, %v475_v43  ;;  %v485_v46 = vpop.f32.mrf.mxu1  ;;  %v557_v34 = vld [vmem:[#allocation3 + $0x38] sm:$0xff]  ;;  %v676_v43 = vpop.permute.xlu0 %675 }
  0xbe   : > { %v682_v48 = vmul.f32 %v621_v37, %v485_v46 }
  0xbf   : > { %v694_v50 = vadd.f32 %v678_v45, %v550_v44  ;;  %v561_v45 = vld [vmem:[#allocation3 + $0x58] sm:$0xff] }
  0xc0   : > { %v698_v51 = vadd.f32 %v682_v48, %v554_v47  ;;  %v565_v47 = vld [vmem:[#allocation3 + $0x78] sm:$0xff] }
  0xc1   : > { %710 = vst [vmem:[#allocation3] sm:$0xff] %v694_v50 }
  0xc2   : > { %714 = vst [vmem:[#allocation3 + $0x20] sm:$0xff] %v698_v51 }
  0xc4   : > { %v495_v54 = vpop.f32.mrf.mxu2  ;;  %v505_v56 = vpop.f32.mrf.mxu3 }
  0xc5   : > { %v686_v58 = vmul.f32 %v641_v49, %v495_v54  ;;  %v690_v59 = vmul.f32 %v661_v53, %v505_v56  ;;  %v477_v60 = vpop.f32.mrf.mxu0  ;;  %v487_v62 = vpop.f32.mrf.mxu1 }
  0xc6   : > { %v679_v0 = vmul.f32 %v606_v36, %v477_v60  ;;  %v683_v1 = vmul.f32 %v626_v40, %v487_v62 }
  0xc7   : > { %v702_v2 = vadd.f32 %v686_v58, %v558_v55  ;;  %v706_v3 = vadd.f32 %v690_v59, %v562_v57 }
  0xc8   : > { %v695_v4 = vadd.f32 %v679_v0, %v551_v61  ;;  %v699_v5 = vadd.f32 %v683_v1, %v555_v63 }
  0xc9   : > { %718 = vst [vmem:[#allocation3 + $0x40] sm:$0xff] %v702_v2 }
  0xca   : > { %722 = vst [vmem:[#allocation3 + $0x60] sm:$0xff] %v706_v3 }
  0xcb   : > { %711 = vst [vmem:[#allocation3 + $0x8] sm:$0xff] %v695_v4 }
  0xcc   : > { %715 = vst [vmem:[#allocation3 + $0x28] sm:$0xff] %v699_v5  ;;  %v497_v8 = vpop.f32.mrf.mxu2  ;;  %v507_v10 = vpop.f32.mrf.mxu3 }
  0xcd   : > { %v687_v12 = vmul.f32 %v646_v42, %v497_v8  ;;  %v691_v13 = vmul.f32 %v666_v7, %v507_v10  ;;  %v480_v14 = vpop.f32.mrf.mxu0  ;;  %v490_v16 = vpop.f32.mrf.mxu1 }
  0xce   : > { %v680_v18 = vmul.f32 %v611_v35, %v480_v14  ;;  %v684_v19 = vmul.f32 %v631_v39, %v490_v16 }
  0xcf   : > { %v703_v20 = vadd.f32 %v687_v12, %v559_v9  ;;  %v707_v21 = vadd.f32 %v691_v13, %v563_v11 }
  0xd0   : > { %v696_v22 = vadd.f32 %v680_v18, %v552_v15  ;;  %v700_v23 = vadd.f32 %v684_v19, %v556_v17 }
  0xd1   : > { %719 = vst [vmem:[#allocation3 + $0x48] sm:$0xff] %v703_v20 }
  0xd2   : > { %723 = vst [vmem:[#allocation3 + $0x68] sm:$0xff] %v707_v21 }
  0xd3   : > { %712 = vst [vmem:[#allocation3 + $0x10] sm:$0xff] %v696_v22 }
  0xd4   : > { %716 = vst [vmem:[#allocation3 + $0x30] sm:$0xff] %v700_v23  ;;  %v500_v25 = vpop.f32.mrf.mxu2  ;;  %v510_v27 = vpop.f32.mrf.mxu3 }
  0xd5   : > { %v688_v29 = vmul.f32 %v651_v52, %v500_v25  ;;  %v692_v30 = vmul.f32 %v671_v24, %v510_v27  ;;  %v482_v31 = vpop.f32.mrf.mxu0  ;;  %v492_v33 = vpop.f32.mrf.mxu1 }
  0xd6   : > { %v681_v35 = vmul.f32 %v1146_v38, %v482_v31  ;;  %v685_v36 = vmul.f32 %v1148_v41, %v492_v33 }
  0xd7   : > { %v704_v37 = vadd.f32 %v688_v29, %v560_v26  ;;  %v708_v39 = vadd.f32 %v692_v30, %v564_v28 }
  0xd8   : > { %v697_v40 = vadd.f32 %v681_v35, %v553_v32  ;;  %v701_v42 = vadd.f32 %v685_v36, %v557_v34 }
  0xd9   : > { %720 = vst [vmem:[#allocation3 + $0x50] sm:$0xff] %v704_v37 }
  0xda   : > { %724 = vst [vmem:[#allocation3 + $0x70] sm:$0xff] %v708_v39 }
  0xdb   : > { %713 = vst [vmem:[#allocation3 + $0x18] sm:$0xff] %v697_v40 }
  0xdc   : > { %717 = vst [vmem:[#allocation3 + $0x38] sm:$0xff] %v701_v42  ;;  %v502_v44 = vpop.f32.mrf.mxu2  ;;  %v512_v46 = vpop.f32.mrf.mxu3 }
  0xdd   : > { %v689_v38 = vmul.f32 %v656_v6, %v502_v44  ;;  %v693_v41 = vmul.f32 %v676_v43, %v512_v46 }
  0xdf   : > { %v705_v48 = vadd.f32 %v689_v38, %v561_v45  ;;  %v709_v49 = vadd.f32 %v693_v41, %v565_v47 }
  0xe1   : > { %721 = vst [vmem:[#allocation3 + $0x58] sm:$0xff] %v705_v48 }
  0xe2   : > { %725 = vst [vmem:[#allocation3 + $0x78] sm:$0xff] %v709_v49 }
  0xe3   : > { %962 = dma.vmem_to_hbm [thread:$0]  (%p965_p6), %s735_s29, 2048, %s737_s5, [#allocation4], %s1058_s6, %s1058_s6, %s1059_s7  }
  0xe4   : > { %1040 = dma.done.wait (%p965_p6), [#allocation4], 2048  }
  0xe5   : > { %1042 = vsyncadd (%p965_p6), [#allocation4], 4294965248 }
  0xe6 PF: > { %s14_s14 = sadd.s32 1, %s1053_s14   ;;  %s1170_s12 = smov %s1049_s13 }
  0xe7   : > { %p11_p7 = scmp.ge.s32.totalorder %s14_s14, 5   ;;  %s1171_s13 = smov %s1173_s16 }
  0xe9   :  { %13 = sbr.rel (!%p11_p7) target bundleno = 2 (0x2), region = 78 }
  0xee   :  { %753 = vsyncpa [#allocation4], 1 }
  0xef   :  { %755 = vsyncpa [#allocation4 + $0x1], 1 }

</bundles_post_ra>
